<compile_context>
chip_gen: v6e
topology: v6e:2x2x1
jax: 0.10.0
libtpu: 0.0.40
codegen_flags: <defaults>
</compile_context>

<pallas_src>
import jax
import jax.numpy as jnp
from jax.experimental import pallas as pl
from jax.experimental.pallas import tpu as pltpu


def _round_up(x, m):
    return ((x + m - 1) // m) * m


def critic_kernel(x_ref, w1_ref, b1_ref, w2_ref, b2_ref, w3_ref, b3_ref, o_ref):
    # x_ref: (TB, S) f32 batch tile; weights/biases are VMEM-resident across steps.
    x = x_ref[...]  # already f32; no redundant astype

    # fc1 + relu   (MXU matmul, f32 accumulate; bias + ReLU on the VPU in f32)
    h1 = jnp.dot(x, w1_ref[...], preferred_element_type=jnp.float32) + b1_ref[...]
    h1 = jnp.maximum(h1, 0.0)

    # fc2 + relu
    h2 = jnp.dot(h1, w2_ref[...], preferred_element_type=jnp.float32) + b2_ref[...]
    h2 = jnp.maximum(h2, 0.0)

    # fc3 (N=1 value head): broadcast-multiply + cross-lane sum on VPU/XLU
    # instead of an MXU matmul that would use <1% of the systolic array.
    v_col = jnp.sum(h2 * w3_ref[...], axis=-1, keepdims=True)      # (TB, 1)
    # Lane-dense store: (1, TB) row, bias added as an SMEM scalar.
    o_ref[...] = (v_col.T + b3_ref[0, 0]).astype(o_ref.dtype)


def critic_forward(state, params):
    """state: [B, state_dim] f32.

    params layout (torch weight.T convention):
      w1: (S, H)   b1: (1, H)
      w2: (H, H)   b2: (1, H)
      w3: (1, H)   (row form of torch fc3.weight)   b3: (1, 1)
    Returns the value estimate with PyTorch's (B, 1) shape.
    """
    w1, b1, w2, b2, w3, b3 = (params["w1"], params["b1"], params["w2"],
                              params["b2"], params["w3"], params["b3"])
    B, S = state.shape
    H = w1.shape[1]

    # Batch tile: multiple of 8 sublanes, capped at 512 rows (512-lane-wide
    # output stores, weights resident, VMEM budget safe on every generation).
    TB = min(512, _round_up(B, 8))
    B_pad = _round_up(B, TB)
    if B_pad != B:
        state = jnp.pad(state, ((0, B_pad - B), (0, 0)))
    n_tiles = B_pad // TB

    out_row = pl.pallas_call(
        critic_kernel,
        out_shape=jax.ShapeDtypeStruct((1, B_pad), jnp.float32),
        grid=(n_tiles,),
        in_specs=[
            pl.BlockSpec((TB, S), lambda i: (i, 0)),            # state tile (pipelined)
            pl.BlockSpec((S, H), lambda i: (0, 0)),             # w1 (VMEM-resident)
            pl.BlockSpec((1, H), lambda i: (0, 0)),             # b1
            pl.BlockSpec((H, H), lambda i: (0, 0)),             # w2
            pl.BlockSpec((1, H), lambda i: (0, 0)),             # b2
            pl.BlockSpec((1, H), lambda i: (0, 0)),             # w3 row
            pl.BlockSpec(memory_space=pltpu.MemorySpace.SMEM),  # b3 scalar in SMEM
        ],
        out_specs=pl.BlockSpec((1, TB), lambda i: (0, i)),      # lane-dense value row
        compiler_params=pltpu.CompilerParams(
            dimension_semantics=("parallel",)),                 # megacore split on v7x
    )(state, w1, b1, w2, b2, w3, b3)

    # Back to the PyTorch Critic output layout: (B, 1).
    return out_row[0, :B].reshape(B, 1)


def init_params(key, state_dim, hidden_dim):
    """Deterministic synthetic init. Weights stored as [in, out] (= torch weight.T);
    w3 is kept as a (1, hidden) row for the VPU value-head reduction."""
    ks = jax.random.split(key, 6)
    s1 = 1.0 / jnp.sqrt(state_dim)
    s2 = 1.0 / jnp.sqrt(hidden_dim)
    return {
        "w1": jax.random.uniform(ks[0], (state_dim, hidden_dim), jnp.float32, -s1, s1),
        "b1": jax.random.uniform(ks[1], (1, hidden_dim), jnp.float32, -s1, s1),
        "w2": jax.random.uniform(ks[2], (hidden_dim, hidden_dim), jnp.float32, -s2, s2),
        "b2": jax.random.uniform(ks[3], (1, hidden_dim), jnp.float32, -s2, s2),
        "w3": jax.random.uniform(ks[4], (1, hidden_dim), jnp.float32, -s2, s2),
        "b3": jax.random.uniform(ks[5], (1, 1), jnp.float32, -s2, s2),
    }


def critic_ref(state, p):
    h1 = jnp.maximum(state @ p["w1"] + p["b1"], 0.0)
    h2 = jnp.maximum(h1 @ p["w2"] + p["b2"], 0.0)
    return h2 @ p["w3"].T + p["b3"]


if __name__ == "__main__":
    key = jax.random.PRNGKey(0)
    k_param, k_state1, k_state2 = jax.random.split(key, 3)

    state_dim, hidden_dim = 4, 32
    params = init_params(k_param, state_dim, hidden_dim)

    # Case 1: small batch (single tile).
    state = jax.random.normal(k_state1, (8, state_dim), jnp.float32)
    out = jax.block_until_ready(critic_forward(state, params))
    ref = critic_ref(state, params)
    assert out.shape == (8, 1), out.shape
    assert jnp.allclose(out, ref, atol=1e-5, rtol=1e-5), "mismatch vs reference (B=8)"

    # Case 2: ragged batch (exercises the pad-to-tile path).
    state2 = jax.random.normal(k_state2, (20, state_dim), jnp.float32)
    out2 = jax.block_until_ready(critic_forward(state2, params))
    ref2 = critic_ref(state2, params)
    assert out2.shape == (20, 1), out2.shape
    assert jnp.allclose(out2, ref2, atol=1e-5, rtol=1e-5), "mismatch vs reference (B=20)"

    print("KERNEL_OK")
</pallas_src>

<mosaic_0001>
module attributes {stable_mosaic.version = 11 : i64} {
  func.func @critic_kernel(%arg0: i32, %arg1: memref<8x4xf32, #tpu.memory_space<vmem>>, %arg2: memref<4x32xf32, #tpu.memory_space<vmem>>, %arg3: memref<1x32xf32, #tpu.memory_space<vmem>>, %arg4: memref<32x32xf32, #tpu.memory_space<vmem>>, %arg5: memref<1x32xf32, #tpu.memory_space<vmem>>, %arg6: memref<1x32xf32, #tpu.memory_space<vmem>>, %arg7: memref<1x1xf32, #tpu.memory_space<smem>>, %arg8: memref<1x8xf32, #tpu.memory_space<vmem>>) attributes {dimension_semantics = [#tpu.dimension_semantics<parallel>], iteration_bounds = array<i64: 1>, scalar_prefetch = 0 : i64, scratch_operands = 0 : i64, tpu.core_type = #tpu.core_type<tc>, window_params = [{transform_indices = @transform_0, window_bounds = array<i64: 8, 4>}, {pipeline_mode = #tpu.pipeline_mode<synchronous>, transform_indices = @transform_1, window_bounds = array<i64: 4, 32>}, {pipeline_mode = #tpu.pipeline_mode<synchronous>, transform_indices = @transform_2, window_bounds = array<i64: 1, 32>}, {pipeline_mode = #tpu.pipeline_mode<synchronous>, transform_indices = @transform_3, window_bounds = array<i64: 32, 32>}, {pipeline_mode = #tpu.pipeline_mode<synchronous>, transform_indices = @transform_4, window_bounds = array<i64: 1, 32>}, {pipeline_mode = #tpu.pipeline_mode<synchronous>, transform_indices = @transform_5, window_bounds = array<i64: 1, 32>}, {transform_indices = @transform_6, window_bounds = array<i64: 1, 1>}, {transform_indices = @transform_7, window_bounds = array<i64: 1, 8>}]} {
    %c0 = arith.constant 0 : index
    %c0_0 = arith.constant 0 : index
    %0 = vector.load %arg1[%c0, %c0_0] : memref<8x4xf32, #tpu.memory_space<vmem>>, vector<8x4xf32>
    %c0_1 = arith.constant 0 : index
    %c0_2 = arith.constant 0 : index
    %1 = vector.load %arg2[%c0_1, %c0_2] : memref<4x32xf32, #tpu.memory_space<vmem>>, vector<4x32xf32>
    %cst = arith.constant dense<0.000000e+00> : vector<8x32xf32>
    %2 = tpu.matmul %0, %1, %cst {dimension_numbers = #tpu.dot_dimension_numbers<[1], [0], [0], [1], [0, 0, 1, 1], [], []>} : vector<8x4xf32>, vector<4x32xf32>, vector<8x32xf32> -> vector<8x32xf32>
    %c0_3 = arith.constant 0 : index
    %c0_4 = arith.constant 0 : index
    %3 = vector.load %arg3[%c0_3, %c0_4] : memref<1x32xf32, #tpu.memory_space<vmem>>, vector<1x32xf32>
    %4 = vector.broadcast %3 : vector<1x32xf32> to vector<8x32xf32>
    %5 = arith.addf %2, %4 : vector<8x32xf32>
    %cst_5 = arith.constant 0.000000e+00 : f32
    %6 = vector.broadcast %cst_5 : f32 to vector<8x32xf32>
    %7 = arith.maximumf %5, %6 : vector<8x32xf32>
    %c0_6 = arith.constant 0 : index
    %c0_7 = arith.constant 0 : index
    %8 = vector.load %arg4[%c0_6, %c0_7] : memref<32x32xf32, #tpu.memory_space<vmem>>, vector<32x32xf32>
    %cst_8 = arith.constant dense<0.000000e+00> : vector<8x32xf32>
    %9 = tpu.matmul %7, %8, %cst_8 {dimension_numbers = #tpu.dot_dimension_numbers<[1], [0], [0], [1], [0, 0, 1, 1], [], []>} : vector<8x32xf32>, vector<32x32xf32>, vector<8x32xf32> -> vector<8x32xf32>
    %c0_9 = arith.constant 0 : index
    %c0_10 = arith.constant 0 : index
    %10 = vector.load %arg5[%c0_9, %c0_10] : memref<1x32xf32, #tpu.memory_space<vmem>>, vector<1x32xf32>
    %11 = vector.broadcast %10 : vector<1x32xf32> to vector<8x32xf32>
    %12 = arith.addf %9, %11 : vector<8x32xf32>
    %cst_11 = arith.constant 0.000000e+00 : f32
    %13 = vector.broadcast %cst_11 : f32 to vector<8x32xf32>
    %14 = arith.maximumf %12, %13 : vector<8x32xf32>
    %c0_12 = arith.constant 0 : index
    %c0_13 = arith.constant 0 : index
    %15 = vector.load %arg6[%c0_12, %c0_13] : memref<1x32xf32, #tpu.memory_space<vmem>>, vector<1x32xf32>
    %16 = vector.broadcast %15 : vector<1x32xf32> to vector<8x32xf32>
    %17 = arith.mulf %14, %16 : vector<8x32xf32>
    %cst_14 = arith.constant dense<0.000000e+00> : vector<8xf32>
    %18 = vector.multi_reduction <add>, %17, %cst_14 [1] : vector<8x32xf32> to vector<8xf32>
    %19 = vector.shape_cast %18 : vector<8xf32> to vector<8x1xf32>
    %20 = tpu.transpose %19, [1, 0] : vector<8x1xf32> -> vector<1x8xf32>
    %c0_15 = arith.constant 0 : index
    %c0_16 = arith.constant 0 : index
    %21 = memref.load %arg7[%c0_15, %c0_16] : memref<1x1xf32, #tpu.memory_space<smem>>
    %22 = vector.broadcast %21 : f32 to vector<1x8xf32>
    %23 = arith.addf %20, %22 : vector<1x8xf32>
    %c0_17 = arith.constant 0 : index
    %c0_18 = arith.constant 0 : index
    %24 = vector.load %arg8[%c0_17, %c0_18] : memref<1x8xf32, #tpu.memory_space<vmem>>, vector<1x8xf32>
    tpu.vector_store %arg8[%c0_17, %c0_18], %23 {strides = array<i32>} : memref<1x8xf32, #tpu.memory_space<vmem>>, vector<1x8xf32>,
    return
  }
  func.func @transform_0(%arg0: i32) -> (i32, i32) {
    %c0_i32 = arith.constant 0 : i32
    %c0_i32_0 = arith.constant 0 : i32
    return %arg0, %c0_i32 : i32, i32
  }
  func.func @transform_1(%arg0: i32) -> (i32, i32) {
    %c0_i32 = arith.constant 0 : i32
    %c0_i32_0 = arith.constant 0 : i32
    %c0_i32_1 = arith.constant 0 : i32
    return %c0_i32, %c0_i32_0 : i32, i32
  }
  func.func @transform_2(%arg0: i32) -> (i32, i32) {
    %c0_i32 = arith.constant 0 : i32
    %c0_i32_0 = arith.constant 0 : i32
    %c0_i32_1 = arith.constant 0 : i32
    return %c0_i32, %c0_i32_0 : i32, i32
  }
  func.func @transform_3(%arg0: i32) -> (i32, i32) {
    %c0_i32 = arith.constant 0 : i32
    %c0_i32_0 = arith.constant 0 : i32
    %c0_i32_1 = arith.constant 0 : i32
    return %c0_i32, %c0_i32_0 : i32, i32
  }
  func.func @transform_4(%arg0: i32) -> (i32, i32) {
    %c0_i32 = arith.constant 0 : i32
    %c0_i32_0 = arith.constant 0 : i32
    %c0_i32_1 = arith.constant 0 : i32
    return %c0_i32, %c0_i32_0 : i32, i32
  }
  func.func @transform_5(%arg0: i32) -> (i32, i32) {
    %c0_i32 = arith.constant 0 : i32
    %c0_i32_0 = arith.constant 0 : i32
    %c0_i32_1 = arith.constant 0 : i32
    return %c0_i32, %c0_i32_0 : i32, i32
  }
  func.func @transform_6(%arg0: i32) -> (i32, i32) {
    %c0_i32 = arith.constant 0 : i32
    %c0_i32_0 = arith.constant 0 : i32
    %c0_i32_1 = arith.constant 0 : i32
    return %c0_i32, %c0_i32_0 : i32, i32
  }
  func.func @transform_7(%arg0: i32) -> (i32, i32) {
    %c0_i32 = arith.constant 0 : i32
    %c0_i32_0 = arith.constant 0 : i32
    return %c0_i32, %arg0 : i32, i32
  }
}

</mosaic_0001>

<bundles_post_ra>
// kernel: tpu_custom_call.1
= control target key start
LH: loop header
LB: loop body
LE: loop exit
PB: predicated region body
PF: predicated region fallthrough
CT: control target
= control target key end

     0   :  { %13 = vsyncpa [#allocation4], 0  ;;  %s428_s0 = inlined_call_operand.vmem [shape: f32[8,4], index: 0, kind: input, shape index: {}]   ;;  %s429_s1 = inlined_call_operand.vmem [shape: f32[4,32], index: 1, kind: input, shape index: {}]   ;;  %s430_s2 = inlined_call_operand.vmem [shape: f32[1,32], index: 2, kind: input, shape index: {}]   ;;  %s431_s3 = inlined_call_operand.hbm [shape: f32[32,32], index: 3, kind: input, shape index: {}]   ;;  %s432_s4 = inlined_call_operand.vmem [shape: f32[1,32], index: 4, kind: input, shape index: {}]   ;;  %s433_s5 = inlined_call_operand.vmem [shape: f32[1,32], index: 5, kind: input, shape index: {}]   ;;  %s434_s6 = inlined_call_operand.<no memory space> [shape: f32[1,1], index: 6, kind: input, shape index: {}]   ;;  %s435_s7 = inlined_call_operand.hbm [shape: f32[1,8], index: 7, kind: output, shape index: {}]  }
   0x1   :  { %14 = vsyncpa [#allocation5], 0  ;;  %s358_s24 = smov [#allocation3]  }
   0x2   :  { %s26_s25 = sshll.u32 %s358_s24, 4  ;;  %s27_s25 = int_to_ptr.vmem [resolvable:$true] %s26_s25 }
   0x3   :  { %s322_s26 = scalar_lea.vmem %s27_s25, 512  ;;  %p327_p1 = scmp.lt.s32.totalorder %s27_s25, %s27_s25 }
   0x4   :  { %p323_p0 = scmp.ne.s32.totalorder %s27_s25, %s322_s26  ;;  %p328_p2 = scmp.lt.s32.totalorder %s322_s26, %s322_s26 }
   0x6   :  { %p329_p3 = por %p328_p2, %p327_p1 }
   0x8   :  { %p330_p4 = pnand %p329_p3, %p323_p0 }
   0xa   :  { %333 = shalt.err (!%p330_p4)
}
   0xb   :  { %s359_s27 = smov 128   ;;  %s360_s28 = smov 8  }
   0xc   :  { %32 = dma.hbm_to_vmem [thread:$0]  %s431_s3, 512, %s27_s25, [#allocation4], %s359_s27, %s359_s27, %s360_s28  }
   0xd   :  { %354 = dma.done.wait [#allocation4], 512  }
   0xe   :  { %355 = vsyncadd [#allocation4], 4294966784  ;;  %v361_v0 = vmov 0.0   ;;  %vm362_vm0 = vmmov 0   ;;  %vm55_vm1 = vcmask 1043456   ;;  %vm51_vm2 = vcmask 31744  }
   0xf   :  { %292 = vmatprep.subr.mxu0 %v361_v0  ;;  %294 = vmatprep.mubr.msk.f32.mxu0 %vm362_vm0, %v361_v0  ;;  %v43_v1 = vld [vmem:[%s429_s1] sm:$0xf]  ;;  %v133_v3 = vld [vmem:[#allocation3 + $0x18] sm:$0xff]  ;;  %v132_v4 = vld [vmem:[#allocation3 + $0x10] sm:$0xff]  ;;  %vm141_vm3 = vcmask 261120   ;;  %v260_v21 = vstv %s434_s6  ;;  %s363_s16 = smov [#allocation6]  }
  0x10   :  { %297 = vmatprep.subr.mxu1 %v361_v0  ;;  %305 = vmatprep.mubr.msk.f32.mxu1 %vm362_vm0, %v361_v0  ;;  %v42_v2 = vld [vmem:[%s428_s0] sm:$0xff]  ;;  %v131_v5 = vld [vmem:[#allocation3 + $0x8] sm:$0xff]  ;;  %s270_s17 = sshll.u32 %s363_s16, 4  ;;  %vm262_vm4 = vcmask 57344   ;;  %s271_s17 = int_to_ptr.vmem [resolvable:$true] %s270_s17 }
  0x11   :  { %293 = vmatpush3.msk.msra.mxu0 %vm55_vm1, %v43_v1  ;;  %298 = vmatpush3.msra.mxu1 %v133_v3  ;;  %v130_v6 = vld [vmem:[#allocation3] sm:$0xff]  ;;  %p339_p6 = scmp.lt.s32.totalorder %s271_s17, %s271_s17 }
  0x12   :  { %295 = vmatmul.mubr.msk.f32.vlgmr.msra.gmra.mxu0 %vm51_vm2, %v42_v2  ;;  %299 = vmatprep.subr.mxu1 %v361_v0  ;;  %v279_v7 = vld [vmem:[%s430_s2] ss:$0 sm:$0xff] }
  0x13   :  { %300 = vmatpush3.msra.mxu1 %v132_v4  ;;  %v282_v12 = vld [vmem:[%s432_s4] ss:$0 sm:$0xff]  ;;  %s334_s4 = scalar_lea.vmem %s271_s17, 16 }
  0x14   :  { %301 = vmatprep.subr.mxu1 %v361_v0  ;;  %v284_v16 = vld [vmem:[%s433_s5] ss:$0 sm:$0xff]  ;;  %p335_p5 = scmp.ne.s32.totalorder %s271_s17, %s334_s4  ;;  %s338_s5 = scalar_lea.vmem %s271_s17, 32 }
  0x15   :  { %302 = vmatpush3.msra.mxu1 %v131_v5  ;;  %p340_p7 = scmp.lt.s32.totalorder %s338_s5, %s334_s4 }
  0x16   :  { %303 = vmatprep.subr.mxu1 %v361_v0 }
  0x17   :  { %304 = vmatpush3.msra.mxu1 %v130_v6  ;;  %p341_p8 = por %p340_p7, %p339_p6 }
  0x19   :  { %p342_p9 = pnand %p341_p8, %p335_p5 }
  0xd2   :  { %v125_v8 = vpop.f32.mrf.mxu0 }
  0xd3   :  { %v126_v9 = vadd.f32 %v279_v7, %v125_v8 }
  0xd4   :  { %v296_v10 = vpop.f32.mrf.mxu0 }
  0xd5   :  { %v129_v11 = vmax.f32 %v126_v9, 0.0 }
  0xd7   :  { %306 = vmatmul.mubr.msk.f32.vlgmr.msra.gmra.mxu1 %vm141_vm3, %v129_v11 }
 0x197   :  { %v211_v13 = vpop.f32.mrf.mxu1 }
 0x198   :  { %v212_v14 = vadd.f32 %v282_v12, %v211_v13 }
 0x199   :  { %v307_v15 = vpop.f32.mrf.mxu1 }
 0x19a   :  { %v215_v17 = vmax.f32 %v212_v14, 0.0 }
 0x19c   :  { %v223_v18 = vmul.f32 %v284_v16, %v215_v17 }
 0x19e   :  { %v224_v19 = vsel %vm141_vm3, %v223_v18, 0.0 }
 0x19f   :  { %225 = vadd.xlane.f32.xlu0 %v224_v19 }
 0x228   :  { %v226_v20 = vpop.xlane.xlu0 %225 }
 0x229   :  { %227 = vxpose.xlu0.b32.start.end [1/1] (short) (narrow) %v226_v20, 8 }
 0x2a5   :  { %v243_v22 = vpop.trf.xlu0 }
 0x2a6   :  { %v261_v23 = vadd.f32 %v260_v21, %v243_v22 }
 0x2a8   :  { %263 = vst.msk [vmem:[#allocation6] sm:$0x1] %vm262_vm4, %v261_v23 }
 0x2a9   :  { %345 = shalt.err (!%p342_p9)
}
 0x2aa   :  { %273 = dma.vmem_to_hbm [thread:$0]  %s271_s17, 16, %s435_s7, [#allocation5]  }
 0x2ab   :  { %356 = dma.done.wait [#allocation5], 16  }
 0x2ac   :  { %357 = vsyncadd [#allocation5], 4294967280 }
 0x2ad   :  { %277 = vsyncpa [#allocation4], 1 }
 0x2ae   :  { %278 = vsyncpa [#allocation5], 1 }

</bundles_post_ra>
